<compile_context>
chip_gen: v6e
topology: v6e:2x2x1
jax: 0.10.0
libtpu: 0.0.40
codegen_flags: <defaults>
</compile_context>

<pallas_src>
import functools

import jax
import jax.numpy as jnp
from jax import lax
from jax.experimental import pallas as pl
from jax.experimental.pallas import tpu as pltpu


# ----------------------------------------------------------------------------
# Kernel: per-sample soft cross-entropy with label smoothing (fused, one upcast)
# ----------------------------------------------------------------------------
def _soft_ce_kernel(pred_ref, tgt_ref, loss_ref, *, sv, confidence, lse_coef):
    # pred_ref: (TN, C) logits (native dtype); tgt_ref: (TN, 1) int32;
    # loss_ref: (TN, 1) f32 per-sample loss.
    x = pred_ref[...].astype(jnp.float32)                        # single upcast
    tgt = tgt_ref[...]                                           # (TN, 1)

    # logsumexp along the class (lane) dim
    mx = jnp.max(x, axis=-1, keepdims=True)                      # (TN, 1)
    lse = mx + jnp.log(jnp.sum(jnp.exp(x - mx), axis=-1, keepdims=True))

    # Gather x at the target index via iota-compare + where-select
    # (no float one-hot, no extra multiply).
    col = lax.broadcasted_iota(jnp.int32, x.shape, 1)            # (TN, C)
    x_t = jnp.sum(jnp.where(col == tgt, x, 0.0), axis=-1, keepdims=True)

    # loss = lse_coef*lse - sv*sum_j x_j - (confidence - sv)*x_t
    # with lse_coef = sv*(C-1) + confidence  (collapses to 1 when n_cls == C).
    loss = lse_coef * lse - (confidence - sv) * x_t
    if sv != 0.0:                          # smoothing == 0: skip the sum(x) pass
        loss = loss - sv * jnp.sum(x, axis=-1, keepdims=True)
    loss_ref[...] = loss


# ----------------------------------------------------------------------------
# Tiling helpers (bytes-based, generation-aware)
# ----------------------------------------------------------------------------
def _round_up(x, m):
    return ((x + m - 1) // m) * m


def _vmem_capacity_bytes():
    try:
        return int(pltpu.get_tpu_info().vmem_capacity_bytes)
    except Exception:
        return 64 * 1024 * 1024            # conservative (v7x-sized) fallback


def _choose_batch_tile(n, c, itemsize, vmem_cap):
    """Pick TN from a VMEM-bytes budget (~half of physical VMEM for the live
    working set of one grid step): 2x double-buffered native-dtype input tile
    plus ~4 f32 (TN, C) compute temporaries (upcast, exp, mask/select, slack).
    Rows are a multiple of 16 for sub-32-bit dtypes (sublane packing), 8 for f32.
    """
    usable = vmem_cap // 2
    bytes_per_row = c * (2 * itemsize + 4 * 4) + 32
    row_mult = 16 if itemsize < 4 else 8
    n_pad = _round_up(n, row_mult)

    tn = max(row_mult, (usable // bytes_per_row) // row_mult * row_mult)
    tn = min(tn, n_pad)

    # Megacore load balance: for small grids prefer an even number of roughly
    # equal steps so both TensorCores get the same work (cannot exceed budget:
    # the recomputed tn is never larger than the VMEM-derived one).
    grid = pl.cdiv(n, tn)
    if grid <= 8:
        target = grid + (grid % 2)         # next even step count (>= 2)
        if n_pad >= target * row_mult:
            tn = max(row_mult, _round_up(pl.cdiv(n_pad, target), row_mult))
    return tn


# ----------------------------------------------------------------------------
# Module wrapper (replicates the PyTorch module's Python-side state)
# ----------------------------------------------------------------------------
class DynamicTopkSoftCrossEntropy:
    def __init__(self, classes, smoothing=0.1, dim=-1, weight=None,
                 reduction_factor=0.05, step_threshold=100):
        assert 0 <= smoothing < 1
        self.confidence = 1.0 - smoothing
        self.smoothing = smoothing
        self.weight = weight  # TODO(synk): per-class weight multiply not wired into the kernel (default is None).
        self.cls = classes
        self.dim = dim        # class axis is the last (lane) dim in this layout
        self.reduction_factor = reduction_factor
        self.k = 1.0
        self.step = 0
        self.min_k = 0.1
        self.step_threshold = step_threshold

    def _per_sample_loss(self, pred, target):
        n, c = pred.shape
        # TODO(synk): for huge vocabularies (C >~ 100k, especially on v7x) add a
        # class-dim grid axis with an online-logsumexp scratch accumulator
        # instead of only shrinking the batch tile.
        vmem_cap = _vmem_capacity_bytes()
        tn = _choose_batch_tile(n, c, jnp.dtype(pred.dtype).itemsize, vmem_cap)
        grid = (pl.cdiv(n, tn),)

        sv = (float(self.smoothing) / (int(self.cls) - 1)) if self.smoothing else 0.0
        lse_coef = sv * (c - 1) + float(self.confidence)   # == 1.0 when self.cls == c

        kern = functools.partial(
            _soft_ce_kernel,
            sv=float(sv),
            confidence=float(self.confidence),
            lse_coef=float(lse_coef),
        )
        return pl.pallas_call(
            kern,
            out_shape=jax.ShapeDtypeStruct((n, 1), jnp.float32),
            grid=grid,
            in_specs=[
                pl.BlockSpec((tn, c), lambda i: (i, 0)),
                pl.BlockSpec((tn, 1), lambda i: (i, 0)),
            ],
            out_specs=pl.BlockSpec((tn, 1), lambda i: (i, 0)),
            compiler_params=pltpu.CompilerParams(
                dimension_semantics=("parallel",),
                vmem_limit_bytes=int(vmem_cap * 3 // 4),
            ),
        )(pred, target.reshape(n, 1).astype(jnp.int32))   # native dtype, no f32 copy

    def _reduce(self, loss_vec):
        # Same semantics as torch: topk(loss, int(N * k), sorted=False).mean(),
        # with k decaying every step_threshold steps.  Clamp m_top >= 1.
        n = int(loss_vec.shape[0])
        m_top = max(1, int(n * self.k))
        self.step += 1
        if self.step % self.step_threshold == 0 and self.k > self.min_k:
            self.k -= self.reduction_factor
        if m_top >= n:
            return jnp.mean(loss_vec)
        # Fixed-shape top-k mean: sort descending + mask-mean, so the traced
        # shapes do not change as k decays (no periodic recompilation stalls).
        srt = jnp.sort(loss_vec)[::-1]
        keep = (jnp.arange(n) < m_top).astype(jnp.float32)
        return jnp.sum(srt * keep) / jnp.float32(m_top)

    def __call__(self, pred, target):
        loss = self._per_sample_loss(pred, target)   # (N, 1) f32
        return self._reduce(loss[:, 0])


# ----------------------------------------------------------------------------
# Pure-JAX reference (for an in-script sanity check)
# ----------------------------------------------------------------------------
def _reference(pred, target, classes, smoothing, k):
    logp = jax.nn.log_softmax(pred.astype(jnp.float32), axis=-1)
    n, c = pred.shape
    sv = smoothing / (classes - 1) if smoothing else 0.0
    true_dist = jnp.full((n, c), sv, jnp.float32)
    true_dist = true_dist.at[jnp.arange(n), target].set(1.0 - smoothing)
    loss = jnp.sum(-true_dist * logp, axis=-1)
    m = max(1, int(n * k))
    top, _ = lax.top_k(loss, m)
    return jnp.mean(top)


if __name__ == "__main__":
    key = jax.random.PRNGKey(0)
    k1, k2, k3, k4 = jax.random.split(key, 4)

    # Check 1: bf16 logits, smoothing=0.1, single/even small grid, k == 1.0 path.
    N1, C1 = 16, 128
    pred1 = jax.random.normal(k1, (N1, C1), dtype=jnp.float32).astype(jnp.bfloat16)
    tgt1 = jax.random.randint(k2, (N1,), 0, C1, dtype=jnp.int32)
    fn1 = DynamicTopkSoftCrossEntropy(classes=C1, smoothing=0.1)
    out1 = jax.block_until_ready(fn1(pred1, tgt1))
    ref1 = _reference(pred1, tgt1, C1, 0.1, 1.0)
    assert jnp.allclose(out1, ref1, rtol=1e-4, atol=1e-5), (out1, ref1)

    # Check 2: f32 logits, smoothing=0.0 (skips sum(x) pass), multi-step grid
    # with a ragged last tile, and the top-k (k < 1) reduction path.
    N2, C2 = 40, 128
    pred2 = jax.random.normal(k3, (N2, C2), dtype=jnp.float32)
    tgt2 = jax.random.randint(k4, (N2,), 0, C2, dtype=jnp.int32)
    fn2 = DynamicTopkSoftCrossEntropy(classes=C2, smoothing=0.0)
    fn2.k = 0.5
    out2 = jax.block_until_ready(fn2(pred2, tgt2))
    ref2 = _reference(pred2, tgt2, C2, 0.0, 0.5)
    assert jnp.allclose(out2, ref2, rtol=1e-4, atol=1e-5), (out2, ref2)

    print("KERNEL_OK")
</pallas_src>

<mosaic_0001>
module attributes {stable_mosaic.version = 11 : i64} {
  func.func @_soft_ce_kernel(%arg0: i32, %arg1: memref<16x128xbf16, #tpu.memory_space<vmem>>, %arg2: memref<16x1xi32, #tpu.memory_space<vmem>>, %arg3: memref<16x1xf32, #tpu.memory_space<vmem>>) attributes {dimension_semantics = [#tpu.dimension_semantics<parallel>], iteration_bounds = array<i64: 1>, scalar_prefetch = 0 : i64, scratch_operands = 0 : i64, tpu.core_type = #tpu.core_type<tc>, window_params = [{transform_indices = @transform_0, window_bounds = array<i64: 16, 128>}, {transform_indices = @transform_1, window_bounds = array<i64: 16, 1>}, {transform_indices = @transform_2, window_bounds = array<i64: 16, 1>}]} {
    %c0 = arith.constant 0 : index
    %c0_0 = arith.constant 0 : index
    %0 = vector.load %arg1[%c0, %c0_0] : memref<16x128xbf16, #tpu.memory_space<vmem>>, vector<16x128xbf16>
    %1 = arith.extf %0 : vector<16x128xbf16> to vector<16x128xf32>
    %c0_1 = arith.constant 0 : index
    %c0_2 = arith.constant 0 : index
    %2 = vector.load %arg2[%c0_1, %c0_2] : memref<16x1xi32, #tpu.memory_space<vmem>>, vector<16x1xi32>
    %cst = arith.constant dense<0xFF800000> : vector<16xf32>
    %3 = vector.multi_reduction <maximumf>, %1, %cst [1] : vector<16x128xf32> to vector<16xf32>
    %4 = vector.shape_cast %3 : vector<16xf32> to vector<16x1xf32>
    %5 = vector.broadcast %4 : vector<16x1xf32> to vector<16x128xf32>
    %6 = arith.subf %1, %5 : vector<16x128xf32>
    %7 = math.exp %6 : vector<16x128xf32>
    %cst_3 = arith.constant dense<0.000000e+00> : vector<16xf32>
    %8 = vector.multi_reduction <add>, %7, %cst_3 [1] : vector<16x128xf32> to vector<16xf32>
    %9 = vector.shape_cast %8 : vector<16xf32> to vector<16x1xf32>
    %10 = math.log %9 : vector<16x1xf32>
    %11 = arith.addf %4, %10 : vector<16x1xf32>
    %12 = tpu.iota {dimensions = array<i32: 1>} : vector<16x128xi32>
    %13 = vector.broadcast %2 : vector<16x1xi32> to vector<16x128xi32>
    %14 = arith.cmpi eq, %12, %13 : vector<16x128xi32>
    %cst_4 = arith.constant 0.000000e+00 : f32
    %15 = vector.broadcast %cst_4 : f32 to vector<16x128xf32>
    %16 = arith.select %14, %1, %15 : vector<16x128xi1>, vector<16x128xf32>
    %cst_5 = arith.constant dense<0.000000e+00> : vector<16xf32>
    %17 = vector.multi_reduction <add>, %16, %cst_5 [1] : vector<16x128xf32> to vector<16xf32>
    %18 = vector.shape_cast %17 : vector<16xf32> to vector<16x1xf32>
    %cst_6 = arith.constant 1.000000e+00 : f32
    %19 = vector.broadcast %cst_6 : f32 to vector<16x1xf32>
    %20 = arith.mulf %19, %11 : vector<16x1xf32>
    %cst_7 = arith.constant 0.899212599 : f32
    %21 = vector.broadcast %cst_7 : f32 to vector<16x1xf32>
    %22 = arith.mulf %21, %18 : vector<16x1xf32>
    %23 = arith.subf %20, %22 : vector<16x1xf32>
    %cst_8 = arith.constant dense<0.000000e+00> : vector<16xf32>
    %24 = vector.multi_reduction <add>, %1, %cst_8 [1] : vector<16x128xf32> to vector<16xf32>
    %25 = vector.shape_cast %24 : vector<16xf32> to vector<16x1xf32>
    %cst_9 = arith.constant 7.87401571E-4 : f32
    %26 = vector.broadcast %cst_9 : f32 to vector<16x1xf32>
    %27 = arith.mulf %26, %25 : vector<16x1xf32>
    %28 = arith.subf %23, %27 : vector<16x1xf32>
    %c0_10 = arith.constant 0 : index
    %c0_11 = arith.constant 0 : index
    %29 = vector.load %arg3[%c0_10, %c0_11] : memref<16x1xf32, #tpu.memory_space<vmem>>, vector<16x1xf32>
    tpu.vector_store %arg3[%c0_10, %c0_11], %28 {strides = array<i32>} : memref<16x1xf32, #tpu.memory_space<vmem>>, vector<16x1xf32>,
    return
  }
  func.func @transform_0(%arg0: i32) -> (i32, i32) {
    %c0_i32 = arith.constant 0 : i32
    %c0_i32_0 = arith.constant 0 : i32
    return %arg0, %c0_i32 : i32, i32
  }
  func.func @transform_1(%arg0: i32) -> (i32, i32) {
    %c0_i32 = arith.constant 0 : i32
    %c0_i32_0 = arith.constant 0 : i32
    return %arg0, %c0_i32 : i32, i32
  }
  func.func @transform_2(%arg0: i32) -> (i32, i32) {
    %c0_i32 = arith.constant 0 : i32
    %c0_i32_0 = arith.constant 0 : i32
    return %arg0, %c0_i32 : i32, i32
  }
}

</mosaic_0001>

<bundles_post_ra>
// kernel: tpu_custom_call.1
= control target key start
LH: loop header
LB: loop body
LE: loop exit
PB: predicated region body
PF: predicated region fallthrough
CT: control target
= control target key end

     0   :  { %v87_v1 = vmov 0   ;;  %v37_v12 = vlaneseq  ;;  %vm65_vm2 = vcmask 7168   ;;  %s118_s0 = inlined_call_operand.vmem [shape: bf16[16,128], index: 0, kind: input, shape index: {}]   ;;  %s119_s1 = inlined_call_operand.vmem [shape: s32[16,1], index: 1, kind: input, shape index: {}]   ;;  %s120_s2 = inlined_call_operand.vmem [shape: f32[16,1], index: 2, kind: output, shape index: {}]  }
   0x1   :  { %v73_v0 = vld [vmem:[%s118_s0] sm:$0xff]   ;;  %77 = vset.pattern.permute.xlu1 %v87_v1  ;;  %78 = vset.pattern.permute.xlu0 %v87_v1  ;;  %v16_v4 = vld [vmem:[%s119_s1 + $0x8] sm:$0xff] }
   0x2   :  { %v15_v2 = vld [vmem:[%s119_s1] sm:$0xff]  ;;  %v74_v3 = vunpack.c.l.bf16 %v73_v0  ;;  %v75_v5 = vunpack.c.h.bf16 %v73_v0  ;;  %v38_v14 = vand.u32 127, %v37_v12 }
   0x3   :  { %40 = vperm.xlu1 %77, %v15_v2  }
   0x4   :  { %17 = vmax.xlane.f32.xlu0 %v74_v3 }
   0x7   :  { %43 = vperm.xlu1 %77, %v16_v4  }
   0x8   :  { %19 = vmax.xlane.f32.xlu0 %v75_v5 }
  0x7e   :  { %v41_v13 = vpop.permute.xlu1 %40 }
  0x7f   :  { %vm45_vm0 = vcmp.eq.s32.totalorder %v38_v14, %v41_v13 }
  0x80   :  { %v47_v17 = vsel %vm45_vm0, %v74_v3, 0.0 }
  0x82   :  { %v44_v16 = vpop.permute.xlu1 %43 }
  0x83   :  { %vm46_vm1 = vcmp.eq.s32.totalorder %v38_v14, %v44_v16 }
  0x84   :  { %v48_v19 = vsel %vm46_vm1, %v75_v5, 0.0 }
  0x8d   :  { %v18_v6 = vpop.xlane.xlu0 %17 }
  0x8e   :  { %v21_v7 = vsub.f32 %v74_v3, %v18_v6 }
  0x90   :  { %v23_v8 = vmul.f32 1.442695, %v21_v7 }
  0x91   :  { %v20_v9 = vpop.xlane.xlu0 %19 }
  0x92   :  { %79 = vpow2.f32 %v23_v8  ;;  %v22_v10 = vsub.f32 %v75_v5, %v20_v9 }
  0x94   :  { %v25_v11 = vmul.f32 1.442695, %v22_v10 }
  0x96   :  { %81 = vpow2.f32 %v25_v11 }
  0x9f   :  { %v80_v15 = vpop.eup %79 }
  0xa0   :  { %27 = vadd.xlane.f32.xlu0 %v80_v15 }
  0xa3   :  { %v82_v18 = vpop.eup %81 }
  0xa4   :  { %29 = vadd.xlane.f32.xlu1 %v82_v18  ;;  %49 = vadd.xlane.f32.xlu0 %v47_v17 }
  0xa8   :  { %51 = vadd.xlane.f32.xlu0 %v48_v19 }
  0xac   :  { %57 = vadd.xlane.f32.xlu0 %v74_v3 }
  0xb0   :  { %59 = vadd.xlane.f32.xlu0 %v75_v5 }
 0x129   :  { %v28_v20 = vpop.xlane.xlu0 %27 }
 0x12a   :  { %83 = vlog2.f32 %v28_v20 }
 0x12d   :  { %v30_v21 = vpop.xlane.xlu1 %29  ;;  %v50_v22 = vpop.xlane.xlu0 %49 }
 0x12e   :  { %85 = vlog2.f32 %v30_v21  ;;  %v53_v28 = vmul.f32 0.8992126, %v50_v22 }
 0x131   :  { %v52_v23 = vpop.xlane.xlu0 %51 }
 0x132   :  { %v54_v35 = vmul.f32 0.8992126, %v52_v23 }
 0x135   :  { %v58_v24 = vpop.xlane.xlu0 %57 }
 0x136   :  { %v61_v29 = vmul.f32 0.0007874016, %v58_v24 }
 0x137   :  { %v84_v25 = vpop.eup %83 }
 0x138   :  { %v32_v26 = vmul.f32 0.6931472, %v84_v25 }
 0x139   :  { %v60_v31 = vpop.xlane.xlu0 %59 }
 0x13a   :  { %v35_v27 = vadd.f32 %v32_v26, %v18_v6  ;;  %v62_v37 = vmul.f32 0.0007874016, %v60_v31 }
 0x13b   :  { %v86_v30 = vpop.eup %85 }
 0x13c   :  { %v34_v32 = vmul.f32 0.6931472, %v86_v30  ;;  %v55_v33 = vsub.f32 %v35_v27, %v53_v28 }
 0x13e   :  { %v36_v34 = vadd.f32 %v34_v32, %v20_v9  ;;  %v63_v36 = vsub.f32 %v55_v33, %v61_v29 }
 0x140   :  { %v56_v38 = vsub.f32 %v36_v34, %v54_v35  ;;  %66 = vst.msk [vmem:[%s120_s2] sm:$0xff] %vm65_vm2, %v63_v36 }
 0x142   :  { %v64_v39 = vsub.f32 %v56_v38, %v62_v37 }
 0x144   :  { %67 = vst.msk [vmem:[%s120_s2 + $0x8] sm:$0xff] %vm65_vm2, %v64_v39 }

</bundles_post_ra>
